<compile_context>
chip_gen: v7x
topology: tpu7x:2x2x1
jax: 0.10.0
libtpu: 0.0.40
codegen_flags: <defaults>
</compile_context>

<pallas_src>
import functools

import jax
import jax.numpy as jnp
from jax.experimental import pallas as pl
from jax.experimental.pallas import tpu as pltpu

# logical / padded dimensions
D_IN, HID, NCLS = 784, 200, 10
D_IN_P, HID_P, NCLS_P = 896, 256, 128   # 7*128, 2*128, 1*128


def _round_up(n, m):
    return ((n + m - 1) // m) * m


def mlp_kernel(x_ref, w1_ref, b1_ref, w2_ref, b2_ref, o_ref):
    # x tile: (TB, 896) bf16 ; weights resident bf16 ; biases f32.
    x = x_ref[...]

    # hidden1: 896 -> 256 (bf16 MXU, f32 accumulate), bias + ReLU in f32.
    h1 = jnp.dot(x, w1_ref[...], preferred_element_type=jnp.float32)
    h1 = jnp.maximum(h1 + b1_ref[...], 0.0)

    # hidden2: 256 -> 128 (bf16 MXU, f32 accumulate), bias + ReLU in f32.
    h2 = jnp.dot(h1.astype(jnp.bfloat16), w2_ref[...],
                 preferred_element_type=jnp.float32)
    h2 = jnp.maximum(h2 + b2_ref[...], 0.0)

    # log_softmax over the first NCLS lanes only (lanes >= NCLS are padding).
    lane = jax.lax.broadcasted_iota(jnp.int32, h2.shape, 1)
    valid = lane < NCLS
    m = jnp.max(jnp.where(valid, h2, -jnp.inf), axis=-1, keepdims=True)
    e = jnp.where(valid, jnp.exp(h2 - m), 0.0)
    lse = m + jnp.log(jnp.sum(e, axis=-1, keepdims=True))

    # lane-dense (TB, 128) store; caller slices [:, :NCLS].
    o_ref[...] = (h2 - lse).astype(o_ref.dtype)


def prepare_params(w1, b1, w2, b2):
    """Pad/transpose/cast effective params once at setup time.

    w1: (200, 784), b1: (200,), w2: (10, 200), b2: (10,)  (PyTorch layout)
    Returns (w1t, b1p, w2t, b2p):
      w1t (896, 256) bf16, b1p (1, 256) f32, w2t (256, 128) bf16, b2p (1, 128) f32.
    Zero padding is numerically exact (padded hidden units are relu(0)=0 and
    feed zero weights; padded classes are masked in the kernel's log_softmax).
    """
    w1t = jnp.zeros((D_IN_P, HID_P), jnp.bfloat16)
    w1t = w1t.at[:D_IN, :HID].set(w1.T.astype(jnp.bfloat16))
    b1p = jnp.zeros((1, HID_P), jnp.float32).at[0, :HID].set(b1.astype(jnp.float32))

    w2t = jnp.zeros((HID_P, NCLS_P), jnp.bfloat16)
    w2t = w2t.at[:HID, :NCLS].set(w2.T.astype(jnp.bfloat16))
    b2p = jnp.zeros((1, NCLS_P), jnp.float32).at[0, :NCLS].set(b2.astype(jnp.float32))
    return w1t, b1p, w2t, b2p


@functools.partial(jax.jit, static_argnames=("tb",))
def subspace_mnist_forward(x, w1t, b1p, w2t, b2p, *, tb=None):
    """x: (B, 784) float32. Returns (B, 10) float32 log-probabilities."""
    B = x.shape[0]
    if tb is None:
        tb = min(1024, _round_up(B, 8))      # fits v5e 16 MiB / v7x 64 MiB VMEM
    tb = max(8, _round_up(tb, 8))
    Bp = _round_up(B, tb)

    # pad batch -> Bp and features 784 -> 896; cast the streamed input to bf16.
    xp = jnp.zeros((Bp, D_IN_P), jnp.bfloat16)
    xp = xp.at[:B, :D_IN].set(x.astype(jnp.bfloat16))

    grid = (Bp // tb,)
    bytes_accessed = (Bp * D_IN_P * 2            # x stream (bf16)
                      + D_IN_P * HID_P * 2       # w1t (resident, fetched once)
                      + HID_P * NCLS_P * 2       # w2t
                      + (HID_P + NCLS_P) * 4     # biases
                      + Bp * NCLS_P * 4)         # output writeback

    out = pl.pallas_call(
        mlp_kernel,
        out_shape=jax.ShapeDtypeStruct((Bp, NCLS_P), jnp.float32),
        grid=grid,
        in_specs=[
            pl.BlockSpec((tb, D_IN_P), lambda i: (i, 0)),    # x: batch-tiled
            pl.BlockSpec((D_IN_P, HID_P), lambda i: (0, 0)),  # w1t: resident
            pl.BlockSpec((1, HID_P), lambda i: (0, 0)),       # b1
            pl.BlockSpec((HID_P, NCLS_P), lambda i: (0, 0)),  # w2t: resident
            pl.BlockSpec((1, NCLS_P), lambda i: (0, 0)),      # b2
        ],
        out_specs=pl.BlockSpec((tb, NCLS_P), lambda i: (i, 0)),
        compiler_params=pltpu.CompilerParams(
            dimension_semantics=("parallel",),   # megacore sharding on v7x
        ),
        cost_estimate=pl.CostEstimate(
            flops=2 * Bp * (D_IN_P * HID_P + HID_P * NCLS_P),
            transcendentals=Bp * NCLS_P,
            bytes_accessed=bytes_accessed,
        ),
    )(xp, w1t, b1p, w2t, b2p)

    return out[:B, :NCLS]


def make_params(intrinsic_dim=16, seed=0):
    """Deterministic parameter setup mirroring SubspaceLinear:
       W_eff = W0 + reshape(P_w @ theta, (out, in)); b_eff = b0 + P_b @ theta.
       theta is zero-initialized (theta.data.fill_(0)) as in the PyTorch module."""
    key = jax.random.PRNGKey(seed)
    k = jax.random.split(key, 8)
    theta = jnp.zeros((intrinsic_dim, 1), dtype=jnp.float32)

    def subspace_linear(kw, kb, kpw, kpb, in_f, out_f):
        w0 = jax.random.normal(kw, (out_f, in_f), jnp.float32) * (1.0 / jnp.sqrt(in_f))
        b0 = jax.random.normal(kb, (out_f,), jnp.float32) * 0.01
        p_w = jax.random.normal(kpw, (out_f * in_f, intrinsic_dim), jnp.float32)
        p_w = p_w / jnp.linalg.norm(p_w, axis=0, keepdims=True)
        p_b = jax.random.normal(kpb, (out_f, intrinsic_dim), jnp.float32)
        p_b = p_b / jnp.linalg.norm(p_b, axis=0, keepdims=True)
        w_eff = w0 + (p_w @ theta).reshape(out_f, in_f)
        b_eff = b0 + (p_b @ theta).reshape(out_f)
        return w_eff, b_eff

    w1, b1 = subspace_linear(k[0], k[1], k[2], k[3], D_IN, HID)
    w2, b2 = subspace_linear(k[4], k[5], k[6], k[7], HID, NCLS)
    return w1, b1, w2, b2


if __name__ == "__main__":
    # Small test: B=20 with tb=8 -> 3 batch tiles (exercises tiling + padding).
    B = 20
    key = jax.random.PRNGKey(0)
    x = jax.random.normal(key, (B, D_IN), dtype=jnp.float32)

    w1, b1, w2, b2 = make_params(intrinsic_dim=16, seed=0)
    w1t, b1p, w2t, b2p = prepare_params(w1, b1, w2, b2)

    out = subspace_mnist_forward(x, w1t, b1p, w2t, b2p, tb=8)
    out = jax.block_until_ready(out)
    assert out.shape == (B, NCLS)

    # Reference in plain JAX using the same bf16-rounded operands the kernel sees.
    hp = jax.lax.Precision.HIGHEST
    xb = x.astype(jnp.bfloat16).astype(jnp.float32)
    w1f = w1.astype(jnp.bfloat16).astype(jnp.float32)
    w2f = w2.astype(jnp.bfloat16).astype(jnp.float32)
    h1 = jnp.maximum(jnp.dot(xb, w1f.T, precision=hp) + b1, 0.0)
    h1 = h1.astype(jnp.bfloat16).astype(jnp.float32)
    h2 = jnp.maximum(jnp.dot(h1, w2f.T, precision=hp) + b2, 0.0)
    ref = jax.nn.log_softmax(h2, axis=-1)

    assert jnp.allclose(out, ref, atol=2e-3, rtol=2e-3), (
        float(jnp.max(jnp.abs(out - ref))))

    print("KERNEL_OK")
</pallas_src>

<mosaic_0001>
module attributes {stable_mosaic.version = 11 : i64} {
  func.func @mlp_kernel(%arg0: i32, %arg1: memref<8x896xbf16, #tpu.memory_space<vmem>>, %arg2: memref<896x256xbf16, #tpu.memory_space<vmem>>, %arg3: memref<1x256xf32, #tpu.memory_space<vmem>>, %arg4: memref<256x128xbf16, #tpu.memory_space<vmem>>, %arg5: memref<1x128xf32, #tpu.memory_space<vmem>>, %arg6: memref<8x128xf32, #tpu.memory_space<vmem>>) attributes {dimension_semantics = [#tpu.dimension_semantics<parallel>], iteration_bounds = array<i64: 3>, scalar_prefetch = 0 : i64, scratch_operands = 0 : i64, tpu.core_type = #tpu.core_type<tc>, window_params = [{transform_indices = @transform_0, window_bounds = array<i64: 8, 896>}, {pipeline_mode = #tpu.pipeline_mode<synchronous>, transform_indices = @transform_1, window_bounds = array<i64: 896, 256>}, {pipeline_mode = #tpu.pipeline_mode<synchronous>, transform_indices = @transform_2, window_bounds = array<i64: 1, 256>}, {pipeline_mode = #tpu.pipeline_mode<synchronous>, transform_indices = @transform_3, window_bounds = array<i64: 256, 128>}, {pipeline_mode = #tpu.pipeline_mode<synchronous>, transform_indices = @transform_4, window_bounds = array<i64: 1, 128>}, {transform_indices = @transform_5, window_bounds = array<i64: 8, 128>}]} {
    %c0 = arith.constant 0 : index
    %c0_0 = arith.constant 0 : index
    %0 = vector.load %arg1[%c0, %c0_0] : memref<8x896xbf16, #tpu.memory_space<vmem>>, vector<8x896xbf16>
    %c0_1 = arith.constant 0 : index
    %c0_2 = arith.constant 0 : index
    %1 = vector.load %arg2[%c0_1, %c0_2] : memref<896x256xbf16, #tpu.memory_space<vmem>>, vector<896x256xbf16>
    %cst = arith.constant dense<0.000000e+00> : vector<8x256xf32>
    %2 = tpu.matmul %0, %1, %cst {dimension_numbers = #tpu.dot_dimension_numbers<[1], [0], [0], [1], [0, 0, 1, 1], [], []>} : vector<8x896xbf16>, vector<896x256xbf16>, vector<8x256xf32> -> vector<8x256xf32>
    %c0_3 = arith.constant 0 : index
    %c0_4 = arith.constant 0 : index
    %3 = vector.load %arg3[%c0_3, %c0_4] : memref<1x256xf32, #tpu.memory_space<vmem>>, vector<1x256xf32>
    %4 = vector.broadcast %3 : vector<1x256xf32> to vector<8x256xf32>
    %5 = arith.addf %2, %4 : vector<8x256xf32>
    %cst_5 = arith.constant 0.000000e+00 : f32
    %6 = vector.broadcast %cst_5 : f32 to vector<8x256xf32>
    %7 = arith.maximumf %5, %6 : vector<8x256xf32>
    %8 = arith.truncf %7 : vector<8x256xf32> to vector<8x256xbf16>
    %c0_6 = arith.constant 0 : index
    %c0_7 = arith.constant 0 : index
    %9 = vector.load %arg4[%c0_6, %c0_7] : memref<256x128xbf16, #tpu.memory_space<vmem>>, vector<256x128xbf16>
    %cst_8 = arith.constant dense<0.000000e+00> : vector<8x128xf32>
    %10 = tpu.matmul %8, %9, %cst_8 {dimension_numbers = #tpu.dot_dimension_numbers<[1], [0], [0], [1], [0, 0, 1, 1], [], []>} : vector<8x256xbf16>, vector<256x128xbf16>, vector<8x128xf32> -> vector<8x128xf32>
    %c0_9 = arith.constant 0 : index
    %c0_10 = arith.constant 0 : index
    %11 = vector.load %arg5[%c0_9, %c0_10] : memref<1x128xf32, #tpu.memory_space<vmem>>, vector<1x128xf32>
    %12 = vector.broadcast %11 : vector<1x128xf32> to vector<8x128xf32>
    %13 = arith.addf %10, %12 : vector<8x128xf32>
    %cst_11 = arith.constant 0.000000e+00 : f32
    %14 = vector.broadcast %cst_11 : f32 to vector<8x128xf32>
    %15 = arith.maximumf %13, %14 : vector<8x128xf32>
    %16 = tpu.iota {dimensions = array<i32: 1>} : vector<8x128xi32>
    %c10_i32 = arith.constant 10 : i32
    %17 = vector.broadcast %c10_i32 : i32 to vector<8x128xi32>
    %18 = arith.cmpi slt, %16, %17 : vector<8x128xi32>
    %cst_12 = arith.constant 0xFF800000 : f32
    %19 = vector.broadcast %cst_12 : f32 to vector<8x128xf32>
    %20 = arith.select %18, %15, %19 : vector<8x128xi1>, vector<8x128xf32>
    %cst_13 = arith.constant dense<0xFF800000> : vector<8xf32>
    %21 = vector.multi_reduction <maximumf>, %20, %cst_13 [1] : vector<8x128xf32> to vector<8xf32>
    %22 = vector.shape_cast %21 : vector<8xf32> to vector<8x1xf32>
    %23 = vector.broadcast %22 : vector<8x1xf32> to vector<8x128xf32>
    %24 = arith.subf %15, %23 : vector<8x128xf32>
    %25 = math.exp %24 : vector<8x128xf32>
    %cst_14 = arith.constant 0.000000e+00 : f32
    %26 = vector.broadcast %cst_14 : f32 to vector<8x128xf32>
    %27 = arith.select %18, %25, %26 : vector<8x128xi1>, vector<8x128xf32>
    %cst_15 = arith.constant dense<0.000000e+00> : vector<8xf32>
    %28 = vector.multi_reduction <add>, %27, %cst_15 [1] : vector<8x128xf32> to vector<8xf32>
    %29 = vector.shape_cast %28 : vector<8xf32> to vector<8x1xf32>
    %30 = math.log %29 : vector<8x1xf32>
    %31 = arith.addf %22, %30 : vector<8x1xf32>
    %32 = vector.broadcast %31 : vector<8x1xf32> to vector<8x128xf32>
    %33 = arith.subf %15, %32 : vector<8x128xf32>
    %c0_16 = arith.constant 0 : index
    %c0_17 = arith.constant 0 : index
    %34 = vector.load %arg6[%c0_16, %c0_17] : memref<8x128xf32, #tpu.memory_space<vmem>>, vector<8x128xf32>
    tpu.vector_store %arg6[%c0_16, %c0_17], %33 {strides = array<i32>} : memref<8x128xf32, #tpu.memory_space<vmem>>, vector<8x128xf32>,
    return
  }
  func.func @transform_0(%arg0: i32) -> (i32, i32) {
    %c0_i32 = arith.constant 0 : i32
    %c0_i32_0 = arith.constant 0 : i32
    return %arg0, %c0_i32 : i32, i32
  }
  func.func @transform_1(%arg0: i32) -> (i32, i32) {
    %c0_i32 = arith.constant 0 : i32
    %c0_i32_0 = arith.constant 0 : i32
    %c0_i32_1 = arith.constant 0 : i32
    return %c0_i32, %c0_i32_0 : i32, i32
  }
  func.func @transform_2(%arg0: i32) -> (i32, i32) {
    %c0_i32 = arith.constant 0 : i32
    %c0_i32_0 = arith.constant 0 : i32
    %c0_i32_1 = arith.constant 0 : i32
    return %c0_i32, %c0_i32_0 : i32, i32
  }
  func.func @transform_3(%arg0: i32) -> (i32, i32) {
    %c0_i32 = arith.constant 0 : i32
    %c0_i32_0 = arith.constant 0 : i32
    %c0_i32_1 = arith.constant 0 : i32
    return %c0_i32, %c0_i32_0 : i32, i32
  }
  func.func @transform_4(%arg0: i32) -> (i32, i32) {
    %c0_i32 = arith.constant 0 : i32
    %c0_i32_0 = arith.constant 0 : i32
    %c0_i32_1 = arith.constant 0 : i32
    return %c0_i32, %c0_i32_0 : i32, i32
  }
  func.func @transform_5(%arg0: i32) -> (i32, i32) {
    %c0_i32 = arith.constant 0 : i32
    %c0_i32_0 = arith.constant 0 : i32
    return %arg0, %c0_i32 : i32, i32
  }
}

</mosaic_0001>

<bundles_post_ra>
// kernel: subspace_mnist_forward.1
= control target key start
LH: loop header
LB: loop body
LE: loop exit
PB: predicated region body
PF: predicated region fallthrough
CT: control target
= control target key end

     0   :  { %10 = vsyncpa [#allocation3], 0  ;;  %s1849_s18 = smov 0   ;;  %s1981_s0 = inlined_call_operand.vmem [shape: bf16[24,896], index: 0, kind: input, shape index: {}]   ;;  %s1982_s1 = inlined_call_operand.hbm [shape: bf16[896,256], index: 1, kind: input, shape index: {}]   ;;  %s1983_s2 = inlined_call_operand.vmem [shape: f32[1,256], index: 2, kind: input, shape index: {}]   ;;  %s1984_s3 = inlined_call_operand.vmem [shape: bf16[256,128], index: 3, kind: input, shape index: {}]   ;;  %s1985_s4 = inlined_call_operand.vmem [shape: f32[1,128], index: 4, kind: input, shape index: {}]   ;;  %s1986_s5 = inlined_call_operand.vmem [shape: f32[24,128], index: 5, kind: output, shape index: {}]  }
   0x1 LB: > { %s1855_s19 = sadd.s32 4294967295, %s1813_s18   ;;  %p1380_p0 = scmp.ge.s32.totalorder %s1813_s18, 1  ;;  %s1813_s18 = sphi %s1849_s18, %s16_s18  }
   0x2   : > { %p157_p1 = scmp.lt.s32.totalorder %s1813_s18, 4  ;;  %s1815_s20 = smov [#allocation2]  }
   0x3   : > { %s169_s21 = sshll.u32 %s1815_s20, 4  ;;  %p1987_p3 = scmp.eq.s32.totalorder %s1855_s19, 0  ;;  %s170_s21 = int_to_ptr.vmem [resolvable:$true] %s169_s21 }
   0x4   : > { %p1859_p2 = pnand %p1380_p0, %p157_p1  ;;  %s1775_s26 = scalar_lea.hbm %s1982_s1, 14336 }
   0x5   : > { %p1776_p6 = scmp.ne.s32.totalorder %s1982_s1, %s1775_s26  ;;  %p1782_p10 = scmp.lt.u32.totalorder %s1775_s26, %s1982_s1 }
   0x6   : > { %s1989_s22 = scalar_select %p1859_p2, 1, 0 }
   0x7   : > { %p1562_p4 = pneg %p1859_p2 }
   0x9   : > { %p1868_p5 = pnand %p1987_p3, %p1562_p4 }
   0xb   : > { %p1777_p7 = pneg %p1868_p5 }
   0xd   : > { %p1778_p8 = pnand %p1777_p7, %p1776_p6 }
   0xf   : > { %p1779_p9 = pneg %p1778_p8 }
  0x11   : > { %p1784_p11 = pnand %p1782_p10, %p1779_p9 }
  0x13   : > { %1787 = shalt.err (!%p1784_p11)
}
  0x14   : > { %s1788_s6 = scalar_lea.vmem %s170_s21, 14336  ;;  %p1796_p1 = scmp.lt.s32.totalorder %s170_s21, %s170_s21 }
  0x15   : > { %p1789_p12 = scmp.ne.s32.totalorder %s170_s21, %s1788_s6  ;;  %p1797_p4 = scmp.lt.s32.totalorder %s1788_s6, %s1788_s6 }
  0x17   : > { %p1791_p13 = pnand %p1789_p12, %p1777_p7  ;;  %p1798_p3 = por %p1797_p4, %p1796_p1 }
  0x19   : > { %p1792_p0 = pneg %p1791_p13 }
  0x1b   : > { %p1799_p2 = pnand %p1798_p3, %p1792_p0 }
  0x1d   : > { %1802 = shalt.err (!%p1799_p2)
}
  0x1e   : > { %s1816_s7 = smov 128   ;;  %s1817_s8 = smov 8  }
  0x1f   : > { %1565 = dma.hbm_to_vmem [thread:$0]  (!%p1868_p5), %s1982_s1, 14336, %s170_s21, [#allocation3], %s1816_s7, %s1816_s7, %s1817_s8  }
  0x20   : > { %p1991_p6 = scmp.ne.s32.totalorder %s1989_s22, 0 }
  0x21   : > { %p1992_p8 = scmp.eq.s32.totalorder (!%p1991_p6), %s1855_s19, 0 }
  0x22   : > { %202 = sbr.rel (%p1991_p6) target bundleno = 931 (0x3a3), region = 40 }
  0x29   : > { %1808 = dma.done.wait (%p1992_p8), [#allocation3], 14336   ;;  %p1993_p7 = pmov %p1992_p8 }
  0x2a   : > { %v1580_v0 = vld [vmem:[#allocation2 + $0x104] ss:$8 sps:$4 sm:$0xff]   ;;  %v1582_v1 = vld [vmem:[#allocation2 + $0x100] ss:$8 sps:$4 sm:$0xff]   ;;  %v1583_v2 = vld [vmem:[#allocation2 + $0x114] ss:$8 sps:$4 sm:$0xff]  }
  0x2b   : > { %1810 = vsyncadd (%p1993_p7), [#allocation3], 4294952960  ;;  %993 = vmatprep.subr.bf16.mxu0 %v1580_v0  ;;  %v1585_v3 = vld [vmem:[#allocation2 + $0x110] ss:$8 sps:$4 sm:$0xff]   ;;  %v1586_v4 = vld [vmem:[#allocation2 + $0x124] ss:$8 sps:$4 sm:$0xff]  }
  0x2c   : > { %994 = vmatpush1.bf16.msra.mxu0 %v1582_v1  ;;  %v1588_v5 = vld [vmem:[#allocation2 + $0x120] ss:$8 sps:$4 sm:$0xff]   ;;  %v1589_v6 = vld [vmem:[#allocation2 + $0x134] ss:$8 sps:$4 sm:$0xff]   ;;  %v1591_v7 = vld [vmem:[#allocation2 + $0x130] ss:$8 sps:$4 sm:$0xff]  }
  0x2d   : > { %995 = vmatprep.subr.bf16.mxu0 %v1583_v2  ;;  %v1604_v8 = vld [vmem:[#allocation2 + $0x4] ss:$8 sps:$4 sm:$0xff]   ;;  %v1606_v9 = vld [vmem:[#allocation2] ss:$8 sps:$4 sm:$0xff]   ;;  %v1610_v11 = vld [vmem:[#allocation2 + $0x14] ss:$8 sps:$4 sm:$0xff]  }
  0x2e   : > { %v1592_v10 = vld [vmem:[#allocation2 + $0x144] ss:$8 sps:$4 sm:$0xff]   ;;  %952 = vmatprep.subr.bf16.mxu1 %v1604_v8  ;;  %v1612_v12 = vld [vmem:[#allocation2 + $0x10] ss:$8 sps:$4 sm:$0xff]   ;;  %v1594_v13 = vld [vmem:[#allocation2 + $0x140] ss:$8 sps:$4 sm:$0xff]  }
  0x2f   : > { %953 = vmatpush1.bf16.msra.mxu1 %v1606_v9  ;;  %v1595_v14 = vld [vmem:[#allocation2 + $0x154] ss:$8 sps:$4 sm:$0xff]   ;;  %v1616_v15 = vld [vmem:[#allocation2 + $0x24] ss:$8 sps:$4 sm:$0xff]   ;;  %v1618_v16 = vld [vmem:[#allocation2 + $0x20] ss:$8 sps:$4 sm:$0xff]  }
  0x30   : > { %996 = vmatpush1.bf16.msra.mxu0 %v1585_v3  ;;  %954 = vmatprep.subr.bf16.mxu1 %v1610_v11  ;;  %p229_p2 = scmp.lt.s32.totalorder %s1855_s19, 2  ;;  %v1597_v17 = vld [vmem:[#allocation2 + $0x150] ss:$8 sps:$4 sm:$0xff]   ;;  %v1622_v18 = vld [vmem:[#allocation2 + $0x34] ss:$8 sps:$4 sm:$0xff]  }
  0x31   : > { %997 = vmatprep.subr.bf16.mxu0 %v1586_v4  ;;  %v1598_v19 = vld [vmem:[#allocation2 + $0x164] ss:$8 sps:$4 sm:$0xff]   ;;  %v1624_v20 = vld [vmem:[#allocation2 + $0x30] ss:$8 sps:$4 sm:$0xff]   ;;  %v1600_v21 = vld [vmem:[#allocation2 + $0x160] ss:$8 sps:$4 sm:$0xff]  }
  0x32   : > { %s1995_s19 = smov (!%p229_p2, %s1855_s19), 2  ;;  %v1628_v22 = vld [vmem:[#allocation2 + $0x44] ss:$8 sps:$4 sm:$0xff]   ;;  %v1601_v23 = vld [vmem:[#allocation2 + $0x174] ss:$8 sps:$4 sm:$0xff]  }
  0x33   : > { %955 = vmatpush1.bf16.msra.mxu1 %v1612_v12  ;;  %v1630_v24 = vld [vmem:[#allocation2 + $0x40] ss:$8 sps:$4 sm:$0xff]   ;;  %s1557_s11 = smul.u32 28, %s1995_s19  ;;  %v1603_v25 = vld [vmem:[#allocation2 + $0x170] ss:$8 sps:$4 sm:$0xff]   ;;  %s1386_s30 = sshll.u32 %s1995_s19, 3 }
  0x34   : > { %998 = vmatpush1.bf16.msra.mxu0 %v1588_v5  ;;  %956 = vmatprep.subr.bf16.mxu1 %v1616_v15  ;;  %v1634_v26 = vld [vmem:[#allocation2 + $0x54] ss:$8 sps:$4 sm:$0xff]   ;;  %v1607_v27 = vld [vmem:[#allocation2 + $0x184] ss:$8 sps:$4 sm:$0xff]   ;;  %v1636_v28 = vld [vmem:[#allocation2 + $0x50] ss:$8 sps:$4 sm:$0xff]   ;;  %s237_s8 = scalar_lea.vmem %s1986_s5, %s1386_s30 }
  0x35   : > { %999 = vmatprep.subr.bf16.mxu0 %v1589_v6  ;;  %s1902_s14 = scalar_lea.vmem %s1981_s0, %s1557_s11  ;;  %v1609_v29 = vld [vmem:[#allocation2 + $0x180] ss:$8 sps:$4 sm:$0xff]   ;;  %v1640_v30 = vld [vmem:[#allocation2 + $0x64] ss:$8 sps:$4 sm:$0xff]   ;;  %v1613_v31 = vld [vmem:[#allocation2 + $0x194] ss:$8 sps:$4 sm:$0xff]  }
  0x36   : > { %v1905_v32 = vld [vmem:[%s1902_s14 + $0x8] sm:$0xff]  ;;  %v1615_v33 = vld [vmem:[#allocation2 + $0x190] ss:$8 sps:$4 sm:$0xff]   ;;  %v1646_v36 = vld [vmem:[#allocation2 + $0x74] ss:$8 sps:$4 sm:$0xff]  }
  0x37   : > { %957 = vmatpush1.bf16.msra.mxu1 %v1618_v16  ;;  %v1642_v34 = vld [vmem:[#allocation2 + $0x60] ss:$8 sps:$4 sm:$0xff]   ;;  %v1390_v35 = vcombine.high %v1905_v32, %v1905_v32  ;;  %v1619_v37 = vld [vmem:[#allocation2 + $0x1a4] ss:$8 sps:$4 sm:$0xff]   ;;  %v1648_v39 = vld [vmem:[#allocation2 + $0x70] ss:$8 sps:$4 sm:$0xff]   ;;  %v1389_v1 = vcombine.low %v1905_v32, %v1905_v32 }
  0x38   : > { %1000 = vmatpush1.bf16.msra.mxu0 %v1591_v7  ;;  %958 = vmatprep.subr.bf16.mxu1 %v1622_v18  ;;  %v1621_v38 = vld [vmem:[#allocation2 + $0x1a0] ss:$8 sps:$4 sm:$0xff]   ;;  %v1652_v40 = vld [vmem:[#allocation2 + $0x84] ss:$8 sps:$4 sm:$0xff]   ;;  %v1625_v41 = vld [vmem:[#allocation2 + $0x1b4] ss:$8 sps:$4 sm:$0xff]  }
  0x39   : > { %1001 = vmatprep.subr.bf16.mxu0 %v1592_v10  ;;  %1025 = vmatprep.mubr.bf16.mxu0 %v1390_v35  ;;  %v1627_v42 = vld [vmem:[#allocation2 + $0x1b0] ss:$8 sps:$4 sm:$0xff]   ;;  %v1654_v43 = vld [vmem:[#allocation2 + $0x80] ss:$8 sps:$4 sm:$0xff]   ;;  %v1660_v44 = vld [vmem:[#allocation2 + $0x94] ss:$8 sps:$4 sm:$0xff]  }
  0x3a   : > { %v1631_v45 = vld [vmem:[#allocation2 + $0x1c4] ss:$8 sps:$4 sm:$0xff]   ;;  %v1633_v46 = vld [vmem:[#allocation2 + $0x1c0] ss:$8 sps:$4 sm:$0xff]   ;;  %v1662_v47 = vld [vmem:[#allocation2 + $0x90] ss:$8 sps:$4 sm:$0xff]  }
  0x3b   : > { %959 = vmatpush1.bf16.msra.mxu1 %v1624_v20  ;;  %v1666_v48 = vld [vmem:[#allocation2 + $0xa4] ss:$8 sps:$4 sm:$0xff]   ;;  %v1637_v49 = vld [vmem:[#allocation2 + $0x1d4] ss:$8 sps:$4 sm:$0xff]   ;;  %v1639_v50 = vld [vmem:[#allocation2 + $0x1d0] ss:$8 sps:$4 sm:$0xff]  }
  0x3c   : > { %1002 = vmatpush1.bf16.msra.mxu0 %v1594_v13  ;;  %960 = vmatprep.subr.bf16.mxu1 %v1628_v22  ;;  %v1668_v51 = vld [vmem:[#allocation2 + $0xa0] ss:$8 sps:$4 sm:$0xff]   ;;  %v1672_v52 = vld [vmem:[#allocation2 + $0xb4] ss:$8 sps:$4 sm:$0xff]   ;;  %v1643_v53 = vld [vmem:[#allocation2 + $0x1e4] ss:$8 sps:$4 sm:$0xff]  }
  0x3d   : > { %1003 = vmatprep.subr.bf16.mxu0 %v1595_v14  ;;  %v1645_v54 = vld [vmem:[#allocation2 + $0x1e0] ss:$8 sps:$4 sm:$0xff]   ;;  %v1674_v56 = vld [vmem:[#allocation2 + $0xb0] ss:$8 sps:$4 sm:$0xff]   ;;  %v1678_v58 = vld [vmem:[#allocation2 + $0xc4] ss:$8 sps:$4 sm:$0xff]  }
  0x3e   : > { %v239_v55 = vld [vmem:[%s1902_s14] sm:$0xff]  ;;  %v1649_v59 = vld [vmem:[#allocation2 + $0x1f4] ss:$8 sps:$4 sm:$0xff]   ;;  %v1651_v60 = vld [vmem:[#allocation2 + $0x1f0] ss:$8 sps:$4 sm:$0xff]  }
  0x3f   : > { %961 = vmatpush1.bf16.msra.mxu1 %v1630_v24  ;;  %v1388_v57 = vcombine.high %v239_v55, %v239_v55  ;;  %v1680_v61 = vld [vmem:[#allocation2 + $0xc0] ss:$8 sps:$4 sm:$0xff]   ;;  %v1684_v62 = vld [vmem:[#allocation2 + $0xd4] ss:$8 sps:$4 sm:$0xff]   ;;  %v1659_v63 = vld [vmem:[#allocation2 + $0x204] ss:$8 sps:$4 sm:$0xff]   ;;  %v1387_v14 = vcombine.low %v239_v55, %v239_v55 }
  0x40   : > { %1004 = vmatpush1.bf16.msra.mxu0 %v1597_v17  ;;  %962 = vmatprep.subr.bf16.mxu1 %v1634_v26  ;;  %v1657_v0 = vld [vmem:[#allocation2 + $0x200] ss:$8 sps:$4 sm:$0xff]   ;;  %v1686_v2 = vld [vmem:[#allocation2 + $0xd0] ss:$8 sps:$4 sm:$0xff]   ;;  %v1690_v3 = vld [vmem:[#allocation2 + $0xe4] ss:$8 sps:$4 sm:$0xff]  }
  0x41   : > { %1005 = vmatprep.subr.bf16.mxu0 %v1598_v19  ;;  %984 = vmatprep.mubr.bf16.mxu1 %v1388_v57  ;;  %v1665_v4 = vld [vmem:[#allocation2 + $0x214] ss:$8 sps:$4 sm:$0xff]   ;;  %v1663_v5 = vld [vmem:[#allocation2 + $0x210] ss:$8 sps:$4 sm:$0xff]   ;;  %v1692_v6 = vld [vmem:[#allocation2 + $0xe0] ss:$8 sps:$4 sm:$0xff]  }
  0x42   : > { %v1696_v7 = vld [vmem:[#allocation2 + $0xf4] ss:$8 sps:$4 sm:$0xff]   ;;  %v1671_v8 = vld [vmem:[#allocation2 + $0x224] ss:$8 sps:$4 sm:$0xff]   ;;  %v1669_v9 = vld [vmem:[#allocation2 + $0x220] ss:$8 sps:$4 sm:$0xff]  }
  0x43   : > { %963 = vmatpush1.bf16.msra.mxu1 %v1636_v28  ;;  %v1698_v10 = vld [vmem:[#allocation2 + $0xf0] ss:$8 sps:$4 sm:$0xff]   ;;  %v1706_v11 = vld [vmem:[#allocation2 + $0x304] ss:$8 sps:$4 sm:$0xff]   ;;  %v1677_v12 = vld [vmem:[#allocation2 + $0x234] ss:$8 sps:$4 sm:$0xff]  }
  0x44   : > { %1006 = vmatpush1.bf16.msra.mxu0 %v1600_v21  ;;  %964 = vmatprep.subr.bf16.mxu1 %v1640_v30  ;;  %v1675_v13 = vld [vmem:[#allocation2 + $0x230] ss:$8 sps:$4 sm:$0xff]   ;;  %v1704_v15 = vld [vmem:[#allocation2 + $0x300] ss:$8 sps:$4 sm:$0xff]   ;;  %v1712_v16 = vld [vmem:[#allocation2 + $0x314] ss:$8 sps:$4 sm:$0xff]  }
  0x45   : > { %1007 = vmatprep.subr.bf16.mxu0 %v1601_v23  ;;  %v1913_v17 = vld [vmem:[%s1902_s14 + $0x10] sm:$0xff]  ;;  %v1683_v18 = vld [vmem:[#allocation2 + $0x244] ss:$8 sps:$4 sm:$0xff]   ;;  %v1681_v21 = vld [vmem:[#allocation2 + $0x240] ss:$8 sps:$4 sm:$0xff]   ;;  %v1818_v24 = vmov 0  }
  0x46   : > { %v1710_v19 = vld [vmem:[#allocation2 + $0x310] ss:$8 sps:$4 sm:$0xff]   ;;  %v1392_v20 = vcombine.high %v1913_v17, %v1913_v17  ;;  %v1718_v22 = vld [vmem:[#allocation2 + $0x324] ss:$8 sps:$4 sm:$0xff]   ;;  %v1689_v23 = vld [vmem:[#allocation2 + $0x254] ss:$8 sps:$4 sm:$0xff]  }
  0x47   : > { %965 = vmatpush1.bf16.msra.mxu1 %v1642_v34  ;;  %v1687_v26 = vld [vmem:[#allocation2 + $0x250] ss:$8 sps:$4 sm:$0xff]   ;;  %v1695_v28 = vld [vmem:[#allocation2 + $0x264] ss:$8 sps:$4 sm:$0xff]   ;;  %v1693_v30 = vld [vmem:[#allocation2 + $0x260] ss:$8 sps:$4 sm:$0xff]  }
  0x48   : > { %1008 = vmatpush1.bf16.msra.mxu0 %v1603_v25  ;;  %966 = vmatprep.subr.bf16.mxu1 %v1646_v36  ;;  %v1716_v25 = vld [vmem:[#allocation2 + $0x320] ss:$8 sps:$4 sm:$0xff]   ;;  %v1701_v32 = vld [vmem:[#allocation2 + $0x274] ss:$8 sps:$4 sm:$0xff]   ;;  %v1699_v34 = vld [vmem:[#allocation2 + $0x270] ss:$8 sps:$4 sm:$0xff]  }
  0x49   : > { %1009 = vmatprep.subr.bf16.mxu0 %v1607_v27  ;;  %v1724_v27 = vld [vmem:[#allocation2 + $0x334] ss:$8 sps:$4 sm:$0xff]   ;;  %v1709_v36 = vld [vmem:[#allocation2 + $0x284] ss:$8 sps:$4 sm:$0xff]   ;;  %v1743_v55 = vld [vmem:[#allocation2 + $0x2e0] ss:$8 sps:$4 sm:$0xff]  }
  0x4a   : > { %v1736_v35 = vld [vmem:[#allocation2 + $0x354] ss:$8 sps:$4 sm:$0xff]   ;;  %v1749_v57 = vld [vmem:[#allocation2 + $0x2f0] ss:$8 sps:$4 sm:$0xff]  }
  0x4b   : > { %967 = vmatpush1.bf16.msra.mxu1 %v1648_v39  ;;  %v1742_v39 = vld [vmem:[#allocation2 + $0x364] ss:$8 sps:$4 sm:$0xff]  }
  0x4c   : > { %1010 = vmatpush1.bf16.msra.mxu0 %v1609_v29  ;;  %968 = vmatprep.subr.bf16.mxu1 %v1652_v40  ;;  %v1722_v29 = vld [vmem:[#allocation2 + $0x330] ss:$8 sps:$4 sm:$0xff]   ;;  %v1715_v40 = vld [vmem:[#allocation2 + $0x294] ss:$8 sps:$4 sm:$0xff]  }
  0x4d   : > { %1011 = vmatprep.subr.bf16.mxu0 %v1613_v31  ;;  %v1730_v31 = vld [vmem:[#allocation2 + $0x344] ss:$8 sps:$4 sm:$0xff]  }
  0x4f   : > { %969 = vmatpush1.bf16.msra.mxu1 %v1654_v43  ;;  %v1748_v43 = vld [vmem:[#allocation2 + $0x374] ss:$8 sps:$4 sm:$0xff]  }
  0x50   : > { %1012 = vmatpush1.bf16.msra.mxu0 %v1615_v33  ;;  %970 = vmatprep.subr.bf16.mxu1 %v1660_v44  ;;  %v1728_v33 = vld [vmem:[#allocation2 + $0x340] ss:$8 sps:$4 sm:$0xff]   ;;  %v1721_v44 = vld [vmem:[#allocation2 + $0x2a4] ss:$8 sps:$4 sm:$0xff]  }
  0x51   : > { %1013 = vmatprep.subr.bf16.mxu0 %v1619_v37  ;;  %v1734_v37 = vld [vmem:[#allocation2 + $0x350] ss:$8 sps:$4 sm:$0xff]  }
  0x53   : > { %971 = vmatpush1.bf16.msra.mxu1 %v1662_v47  ;;  %v1727_v47 = vld [vmem:[#allocation2 + $0x2b4] ss:$8 sps:$4 sm:$0xff]  }
  0x54   : > { %1014 = vmatpush1.bf16.msra.mxu0 %v1621_v38  ;;  %972 = vmatprep.subr.bf16.mxu1 %v1666_v48  ;;  %v1707_v38 = vld [vmem:[#allocation2 + $0x280] ss:$8 sps:$4 sm:$0xff]   ;;  %v1754_v48 = vld [vmem:[%s1902_s14 + $0x18] ss:$0 sps:$4 sm:$0xff]  }
  0x55   : > { %1015 = vmatprep.subr.bf16.mxu0 %v1625_v41  ;;  %v1740_v41 = vld [vmem:[#allocation2 + $0x360] ss:$8 sps:$4 sm:$0xff]  }
  0x57   : > { %973 = vmatpush1.bf16.msra.mxu1 %v1668_v51  ;;  %v1731_v51 = vld [vmem:[#allocation2 + $0x2c0] ss:$8 sps:$4 sm:$0xff]  }
  0x58   : > { %1016 = vmatpush1.bf16.msra.mxu0 %v1627_v42  ;;  %974 = vmatprep.subr.bf16.mxu1 %v1672_v52  ;;  %v1713_v42 = vld [vmem:[#allocation2 + $0x290] ss:$8 sps:$4 sm:$0xff]   ;;  %v1739_v52 = vld [vmem:[#allocation2 + $0x2d4] ss:$8 sps:$4 sm:$0xff]  }
  0x59   : > { %1017 = vmatprep.subr.bf16.mxu0 %v1631_v45  ;;  %v1746_v45 = vld [vmem:[#allocation2 + $0x370] ss:$8 sps:$4 sm:$0xff]  }
  0x5b   : > { %975 = vmatpush1.bf16.msra.mxu1 %v1674_v56  ;;  %v1751_v56 = vld [vmem:[#allocation2 + $0x2f4] ss:$8 sps:$4 sm:$0xff]  }
  0x5c   : > { %1018 = vmatpush1.bf16.msra.mxu0 %v1633_v46  ;;  %976 = vmatprep.subr.bf16.mxu1 %v1678_v58  ;;  %v1719_v46 = vld [vmem:[#allocation2 + $0x2a0] ss:$8 sps:$4 sm:$0xff]   ;;  %v1391_v58 = vcombine.low %v1913_v17, %v1913_v17 }
  0x5d   : > { %1019 = vmatprep.subr.bf16.mxu0 %v1637_v49  ;;  %v1725_v49 = vld [vmem:[#allocation2 + $0x2b0] ss:$8 sps:$4 sm:$0xff]  }
  0x5f   : > { %977 = vmatpush1.bf16.msra.mxu1 %v1680_v61  ;;  %v1757_v61 = vld [vmem:[%s1984_s3 + $0x48] sm:$0xff]  }
  0x60   : > { %1020 = vmatpush1.bf16.msra.mxu0 %v1639_v50  ;;  %978 = vmatprep.subr.bf16.mxu1 %v1684_v62  ;;  %v1733_v50 = vld [vmem:[#allocation2 + $0x2c4] ss:$8 sps:$4 sm:$0xff]  }
  0x61   : > { %1021 = vmatprep.subr.bf16.mxu0 %v1643_v53  ;;  %v1737_v53 = vld [vmem:[#allocation2 + $0x2d0] ss:$8 sps:$4 sm:$0xff]   ;;  %v1758_v62 = vld [vmem:[%s1984_s3 + $0x8] sm:$0xff]  }
  0x63   : > { %979 = vmatpush1.bf16.msra.mxu1 %v1686_v2  ;;  %v1762_v2 = vld [vmem:[%s1984_s3 + $0x18] sm:$0xff]  }
  0x64   : > { %1022 = vmatpush1.bf16.msra.mxu0 %v1645_v54  ;;  %980 = vmatprep.subr.bf16.mxu1 %v1690_v3  ;;  %v1745_v54 = vld [vmem:[#allocation2 + $0x2e4] ss:$8 sps:$4 sm:$0xff]  }
  0x65   : > { %1023 = vmatprep.subr.bf16.mxu0 %v1649_v59  ;;  %v1755_v59 = vld [vmem:[%s1984_s3 + $0x40] sm:$0xff]  }
  0x66   : > { %v1763_v3 = vld [vmem:[%s1984_s3 + $0x60] sm:$0xff]  }
  0x67   : > { %981 = vmatpush1.bf16.msra.mxu1 %v1692_v6  ;;  %v1766_v6 = vld [vmem:[%s1984_s3 + $0x28] sm:$0xff]  }
  0x68   : > { %1024 = vmatpush1.bf16.msra.mxu0 %v1651_v60  ;;  %982 = vmatprep.subr.bf16.mxu1 %v1696_v7  ;;  %v1756_v60 = vld [vmem:[%s1984_s3] sm:$0xff]   ;;  %v1767_v7 = vld [vmem:[%s1984_s3 + $0x70] sm:$0xff]  }
  0x69   : > { %1034 = vmatprep.subr.bf16.mxu0 %v1659_v63  ;;  %v1759_v63 = vld [vmem:[%s1984_s3 + $0x50] sm:$0xff]  }
  0x6b   : > { %1026 = vmatmul.mubr.bf16.vlgmr.msra.gmra.mrb[0].mxu0 %v1389_v1  ;;  %983 = vmatpush1.bf16.msra.mxu1 %v1698_v10  ;;  %v1761_v1 = vld [vmem:[%s1984_s3 + $0x58] sm:$0xff]  }
  0x6c   : > { %1035 = vmatpush1.bf16.msra.mxu0 %v1657_v0  ;;  %1075 = vmatprep.subr.bf16.mxu1 %v1706_v11  ;;  %v1760_v0 = vld [vmem:[%s1984_s3 + $0x10] sm:$0xff]   ;;  %v1770_v10 = vld [vmem:[%s1984_s3 + $0x38] sm:$0xff]  }
  0x6d   : > { %1036 = vmatprep.subr.bf16.mxu0 %v1665_v4  ;;  %1066 = vmatprep.mubr.bf16.mxu0 %v1392_v20  ;;  %v1764_v4 = vld [vmem:[%s1984_s3 + $0x20] sm:$0xff]  }
  0x6e   : > { %985 = vmatmul.mubr.bf16.vlgmr.msra.gmra.mrb[0].mxu1 %v1387_v14 }
  0x6f   : > { %1076 = vmatpush1.bf16.msra.mxu1 %v1704_v15  ;;  %1107 = vmatprep.mubr.bf16.mxu1 %v1818_v24 }
  0x70   : > { %1037 = vmatpush1.bf16.msra.mxu0 %v1663_v5  ;;  %1077 = vmatprep.subr.bf16.mxu1 %v1712_v16  ;;  %v1765_v5 = vld [vmem:[%s1984_s3 + $0x68] sm:$0xff]  }
  0x71   : > { %1038 = vmatprep.subr.bf16.mxu0 %v1671_v8  ;;  %v1768_v8 = vld [vmem:[%s1984_s3 + $0x30] sm:$0xff]  }
  0x73   : > { %1078 = vmatpush1.bf16.msra.mxu1 %v1710_v19  ;;  %v357_v19 = vlaneseq }
  0x74   : > { %1039 = vmatpush1.bf16.msra.mxu0 %v1669_v9  ;;  %1079 = vmatprep.subr.bf16.mxu1 %v1718_v22  ;;  %v1769_v9 = vld [vmem:[%s1984_s3 + $0x78] sm:$0xff]   ;;  %v355_v22 = vld [vmem:[%s1983_s2] sm:$0x3] }
  0x75   : > { %1040 = vmatprep.subr.bf16.mxu0 %v1677_v12  ;;  %v358_v20 = vshrl.u32 %v357_v19, 7 }
  0x77   : > { %1080 = vmatpush1.bf16.msra.mxu1 %v1716_v25 }
  0x78   : > { %1041 = vmatpush1.bf16.msra.mxu0 %v1675_v13  ;;  %1081 = vmatprep.subr.bf16.mxu1 %v1724_v27 }
  0x79   : > { %1042 = vmatprep.subr.bf16.mxu0 %v1683_v18 }
  0x7b   : > { %1082 = vmatpush1.bf16.msra.mxu1 %v1722_v29 }
  0x7c   : > { %1043 = vmatpush1.bf16.msra.mxu0 %v1681_v21  ;;  %1083 = vmatprep.subr.bf16.mxu1 %v1730_v31  ;;  %v359_v21 = vsub.s32 0, %v358_v20 }
  0x7d   : > { %1044 = vmatprep.subr.bf16.mxu0 %v1689_v23  ;;  %v363_v23 = vsub.s32 1, %v358_v20 }
  0x7e   : > { %v360_v24 = vrot.slane %v355_v22, %v359_v21 }
  0x7f   : > { %1084 = vmatpush1.bf16.msra.mxu1 %v1728_v33  ;;  %v364_v25 = vrot.slane %v355_v22, %v363_v23 }
  0x80   : > { %1045 = vmatpush1.bf16.msra.mxu0 %v1687_v26  ;;  %1085 = vmatprep.subr.bf16.mxu1 %v1736_v35 }
  0x81   : > { %1046 = vmatprep.subr.bf16.mxu0 %v1695_v28 }
  0x83   : > { %1086 = vmatpush1.bf16.msra.mxu1 %v1734_v37 }
  0x84   : > { %1047 = vmatpush1.bf16.msra.mxu0 %v1693_v30  ;;  %1087 = vmatprep.subr.bf16.mxu1 %v1742_v39 }
  0x85   : > { %1048 = vmatprep.subr.bf16.mxu0 %v1701_v32 }
  0x87   : > { %1088 = vmatpush1.bf16.msra.mxu1 %v1740_v41  ;;  %v1506_v41 = vld [vmem:[%s1985_s4] ss:$0 sm:$0xff] }
  0x88   : > { %1049 = vmatpush1.bf16.msra.mxu0 %v1699_v34  ;;  %1089 = vmatprep.subr.bf16.mxu1 %v1748_v43  ;;  %v1297_v43 = vand.u32 127, %v357_v19 }
  0x89   : > { %1050 = vmatprep.subr.bf16.mxu0 %v1709_v36 }
  0x8a   : > { %vm1298_vm0 = vcmp.lt.s32.totalorder %v1297_v43, 10 }
  0x8b   : > { %1090 = vmatpush1.bf16.msra.mxu1 %v1746_v45 }
  0x8c   : > { %1051 = vmatpush1.bf16.msra.mxu0 %v1707_v38  ;;  %1525 = vmatprep.subr.bf16.mxu1 %v1755_v59 }
  0x8d   : > { %1052 = vmatprep.subr.bf16.mxu0 %v1715_v40 }
  0x8e   : > { %1108 = vmatmul.mubr.bf16.vlgmr.msra.gmra.mrb[4].mxu1 %v1754_v48 }
  0x8f   : > { %1526 = vmatpush3.bf16.msra.mxu1 %v1756_v60 }
  0x90   : > { %1053 = vmatpush1.bf16.msra.mxu0 %v1713_v42  ;;  %1527 = vmatprep.subr.bf16.mxu1 %v1757_v61 }
  0x91   : > { %1054 = vmatprep.subr.bf16.mxu0 %v1721_v44 }
  0x93   : > { %1528 = vmatpush3.bf16.msra.mxu1 %v1758_v62 }
  0x94   : > { %1055 = vmatpush1.bf16.msra.mxu0 %v1719_v46  ;;  %1529 = vmatprep.subr.bf16.mxu1 %v1759_v63 }
  0x95   : > { %1056 = vmatprep.subr.bf16.mxu0 %v1727_v47 }
  0x97   : > { %1530 = vmatpush3.bf16.msra.mxu1 %v1760_v0 }
  0x98   : > { %1057 = vmatpush1.bf16.msra.mxu0 %v1725_v49  ;;  %1531 = vmatprep.subr.bf16.mxu1 %v1761_v1 }
  0x99   : > { %1058 = vmatprep.subr.bf16.mxu0 %v1733_v50 }
  0x9b   : > { %1532 = vmatpush3.bf16.msra.mxu1 %v1762_v2 }
  0x9c   : > { %1059 = vmatpush1.bf16.msra.mxu0 %v1731_v51  ;;  %1533 = vmatprep.subr.bf16.mxu1 %v1763_v3 }
  0x9d   : > { %1060 = vmatprep.subr.bf16.mxu0 %v1739_v52 }
  0x9f   : > { %1534 = vmatpush3.bf16.msra.mxu1 %v1764_v4 }
  0xa0   : > { %1061 = vmatpush1.bf16.msra.mxu0 %v1737_v53  ;;  %1535 = vmatprep.subr.bf16.mxu1 %v1765_v5 }
  0xa1   : > { %1062 = vmatprep.subr.bf16.mxu0 %v1745_v54 }
  0xa3   : > { %1536 = vmatpush3.bf16.msra.mxu1 %v1766_v6 }
  0xa4   : > { %1063 = vmatpush1.bf16.msra.mxu0 %v1743_v55  ;;  %1537 = vmatprep.subr.bf16.mxu1 %v1767_v7 }
  0xa5   : > { %1064 = vmatprep.subr.bf16.mxu0 %v1751_v56 }
  0xa7   : > { %1538 = vmatpush3.bf16.msra.mxu1 %v1768_v8 }
  0xa8   : > { %1065 = vmatpush1.bf16.msra.mxu0 %v1749_v57  ;;  %1539 = vmatprep.subr.bf16.mxu1 %v1769_v9 }
  0xab   : > { %1067 = vmatmul.mubr.bf16.vlgmr.msra.gmra.mrb[0].mxu0 %v1391_v58  ;;  %1540 = vmatpush3.bf16.msra.mxu1 %v1770_v10 }
 0x141   : > { %v986_v11 = vpop.f32.mrb[0].mxu1 }
 0x142   : > { %v988_v12 = vpop.f32.mrb[1].mxu1  ;;  %v987_v26 = vadd.f32 %v986_v11, %v360_v24 }
 0x143   : > { %v990_v13 = vpop.f32.mrb[2].mxu1  ;;  %v989_v27 = vadd.f32 %v988_v12, %v364_v25 }
 0x144   : > { %v991_v14 = vpop.f32.mrb[3].mxu1 }
 0x161   : > { %v1109_v15 = vpop.f32.mrb[4].mxu1 }
 0x162   : > { %v1111_v16 = vpop.f32.mrb[5].mxu1 }
 0x163   : > { %v1113_v17 = vpop.f32.mrb[6].mxu1 }
 0x164   : > { %v1114_v18 = vpop.f32.mrb[7].mxu1 }
 0x17e   : > { %v1068_v28 = vpop.f32.mrb[0].mxu0 }
 0x17f   : > { %v1548_v29 = vadd.f32 %v1068_v28, %v987_v26  ;;  %v1070_v30 = vpop.f32.mrb[1].mxu0 }
 0x180   : > { %v1551_v31 = vadd.f32 %v1070_v30, %v989_v27  ;;  %v1072_v32 = vpop.f32.mrb[2].mxu0 }
 0x181   : > { %v1549_v33 = vadd.f32 %v1548_v29, %v1109_v15  ;;  %v1073_v34 = vpop.f32.mrb[3].mxu0 }
 0x182   : > { %v1552_v35 = vadd.f32 %v1551_v31, %v1111_v16 }
 0x183   : > { %v1116_v36 = vmax.f32 %v1549_v33, 0.0 }
 0x184   : > { %v1117_v37 = vmax.f32 %v1552_v35, 0.0 }
 0x185   : > { %v1118_v39 = vpack.c.bf16 %v1116_v36, %v1116_v36 }
 0x186   : > { %v1119_v38 = vpack.c.bf16 %v1117_v37, %v1117_v37 }
 0x188   : > { %1287 = vmatprep.mubr.bf16.mxu1 %v1119_v38 }
 0x189   : > { %1288 = vmatmul.mubr.bf16.vlgmr.msra.gmra.mrb[8].mxu1 %v1118_v39 }
 0x25c   : > { %v1541_v40 = vpop.f32.mrb[8].mxu1 }
 0x25d   : > { %v1542_v42 = vpop.f32.mrb[9].mxu1 }
 0x25e   : > { %v1543_v44 = vadd.f32 %v1542_v42, %v1541_v40  ;;  %v1544_v45 = vpop.f32.mrb[10].mxu1 }
 0x25f   : > { %v1545_v46 = vpop.f32.mrb[11].mxu1 }
 0x260   : > { %v1290_v47 = vadd.f32 %v1543_v44, %v1506_v41 }
 0x262   : > { %v1295_v48 = vmax.f32 %v1290_v47, 0.0 }
 0x264   : > { %v1299_v49 = vsel %vm1298_vm0, %v1295_v48, -inf }
 0x265   : > { %1300 = vmax.xlane.f32.xlu0 %v1299_v49 }
 0x2f2   : > { %v1301_v50 = vpop.xlane.xlu0 %1300 }
 0x2f3   : > { %v1302_v51 = vsub.f32 %v1295_v48, %v1301_v50 }
 0x2f5   : > { %v1303_v52 = vmul.f32 1.442695, %v1302_v51 }
 0x2f7   : > { %1771 = vpow2.f32 %v1303_v52 }
 0x301   : > { %v1772_v53 = vpop.eup %1771 }
 0x302   : > { %v1305_v54 = vsel %vm1298_vm0, %v1772_v53, 0.0 }
 0x303   : > { %1306 = vadd.xlane.f32.xlu0 %v1305_v54 }
 0x390   : > { %v1307_v55 = vpop.xlane.xlu0 %1306 }
 0x391   : > { %1773 = vlog2.f32 %v1307_v55 }
 0x39b   : > { %v1774_v56 = vpop.eup %1773 }
 0x39c   : > { %v1309_v57 = vmul.f32 0.6931472, %v1774_v56 }
 0x39e   : > { %v1310_v58 = vadd.f32 %v1309_v57, %v1301_v50 }
 0x3a0   : > { %v1311_v59 = vsub.f32 %v1295_v48, %v1310_v58 }
 0x3a2   : > { %1312 = vst [vmem:[%s237_s8] sm:$0xff] %v1311_v59 }
 0x3a3 PF: > { %s16_s18 = sadd.s32 1, %s1813_s18  }
 0x3a4   : > { %p13_p3 = scmp.ge.s32.totalorder %s16_s18, 5  }
 0x3a6   :  { %15 = sbr.rel (!%p13_p3) target bundleno = 1 (0x1), region = 75 }
 0x3ad   :  { %1332 = vsyncpa [#allocation3], 1 }
 0x3ae   :  { %1334 = vsyncpa [#allocation3 + $0x1], 1 }

</bundles_post_ra>
